<compile_context>
chip_gen: v5e
topology: v5e:2x2
jax: 0.10.0
libtpu: 0.0.40
codegen_flags: <defaults>
</compile_context>

<pallas_src>
import functools

import jax
import jax.numpy as jnp
from jax.experimental import pallas as pl
from jax.experimental.pallas import tpu as pltpu

# Model hyperparameters (small, deterministic, in-script).
N_EMBD = 32
HIDDEN = 4 * N_EMBD          # 128
DROPOUT = 0.0                # eval-mode dropout == identity

_INV_SQRT2 = 0.7071067811865476
_SQRT_2_OVER_PI = 0.7978845608028654


def _round_up(a, b):
    return -(-a // b) * b


def _gelu(h_f32, out_dtype, approx):
    """GELU on the f32 MXU output; returns the storage dtype for matmul #2."""
    if approx:
        # tanh approximation: the transcendental goes to the EUP slot (free wrt
        # the VALU); elementwise work runs in the storage dtype when 16-bit.
        h = h_f32.astype(out_dtype) if jnp.dtype(out_dtype).itemsize == 2 else h_f32
        inner = _SQRT_2_OVER_PI * (h + 0.044715 * (h * h * h))
        return (0.5 * h * (1.0 + jnp.tanh(inner))).astype(out_dtype)
    # Exact erf form (torch.nn.GELU() default).  The erf polynomial is kept in
    # f32 for parity; the cheap scaling + down-cast happen in the storage dtype
    # when it is 16-bit (bf16 VALUs on v6e/v7x).
    e = jax.lax.erf(h_f32 * _INV_SQRT2)
    if jnp.dtype(out_dtype).itemsize == 2:
        return h_f32.astype(out_dtype) * (0.5 * (1.0 + e)).astype(out_dtype)
    return (0.5 * h_f32 * (1.0 + e)).astype(out_dtype)


def _ffn_resident_kernel(x_ref, w1_ref, w2_ref, o_ref, *, approx_gelu):
    """Per token tile: out = gelu(x @ w1) @ w2 with VMEM-resident weights."""
    h = jnp.dot(x_ref[...], w1_ref[...], preferred_element_type=jnp.float32)
    h = _gelu(h, w2_ref.dtype, approx_gelu)
    o_ref[...] = jnp.dot(h, w2_ref[...],
                         preferred_element_type=jnp.float32).astype(o_ref.dtype)
    # Dropout: identity at inference.
    # TODO(synk): training-mode dropout mask (pltpu.prng_seed +
    # pltpu.prng_random_bits) not wired in; DROPOUT=0 / eval only.


def _ffn_streamed_kernel(x_ref, w1_ref, w2_ref, o_ref, acc_ref, *, approx_gelu):
    """(token tile, hidden slab) step; f32 accumulation over hidden slabs."""
    j = pl.program_id(1)
    h = jnp.dot(x_ref[...], w1_ref[...], preferred_element_type=jnp.float32)
    h = _gelu(h, w2_ref.dtype, approx_gelu)
    part = jnp.dot(h, w2_ref[...], preferred_element_type=jnp.float32)

    @pl.when(j == 0)
    def _first():
        acc_ref[...] = part          # write directly: no zero-init + RMW

    @pl.when(j > 0)
    def _rest():
        acc_ref[...] += part

    @pl.when(j == pl.num_programs(1) - 1)
    def _finalize():
        o_ref[...] = acc_ref[...].astype(o_ref.dtype)


@functools.partial(jax.jit,
                   static_argnames=("tm", "th", "resident", "approx_gelu"))
def gpt_feed_forward(x, w1_t, w2_t, *, tm=None, th=None, resident=None,
                     approx_gelu=False):
    """x: (B, T, C);  w1_t: (C, 4C) = W1.T;  w2_t: (4C, C) = W2.T."""
    B, T, C = x.shape
    H = w1_t.shape[1]
    assert w1_t.shape == (C, H) and w2_t.shape == (H, C)
    M = B * T
    itemsize = jnp.dtype(x.dtype).itemsize
    pack = 16 if itemsize == 2 else 8       # packed-sublane minimum tile rows

    if resident is None:
        # Resident weights iff both matrices (conservatively counted as
        # double-buffered) fit a v7x-safe slice of VMEM (64 MiB physical there,
        # 128 MiB on v5e/v6e).  GPT widths up to ~C=1024 bf16 qualify.
        resident = 2 * 2 * C * H * itemsize <= 32 * 1024 * 1024

    # Token tile.  Resident form is compute-bound once the weights sit in VMEM;
    # the streamed form needs tm near/above the v6e/v7x ridge (~650 FLOPs per
    # weight byte) to stay MXU-bound instead of HBM-bound.
    if tm is None:
        tm = 512 if resident else 1024
    tm = max(pack, _round_up(min(tm, _round_up(M, pack)), pack))
    if tm >= M and M >= 2 * pack:
        # Keep >= 2 token tiles so the 'parallel' axis spans both v7x TCs.
        tm = _round_up(-(-M // 2), pack)
    M_pad = _round_up(M, tm)

    x2d = x.reshape(M, C)
    if M_pad != M:
        # Ragged B*T: zero-pad token axis (gelu(0) = 0 -> padded rows stay 0).
        x2d = jnp.pad(x2d, ((0, M_pad - M), (0, 0)))

    if resident:
        grid = (M_pad // tm,)
        in_specs = [
            pl.BlockSpec((tm, C), lambda i: (i, 0)),   # x: streamed token tile
            pl.BlockSpec((C, H), lambda i: (0, 0)),    # W1^T: fetched once
            pl.BlockSpec((H, C), lambda i: (0, 0)),    # W2^T: fetched once
        ]
        out_specs = pl.BlockSpec((tm, C), lambda i: (i, 0))
        scratch_shapes = []
        dim_sem = ("parallel",)
        kernel = functools.partial(_ffn_resident_kernel, approx_gelu=approx_gelu)
        bytes_accessed = itemsize * (2 * M_pad * C + 2 * C * H)
    else:
        if th is None:
            th = min(512, H)
            if H % th:
                th = H
        assert H % th == 0 and (th % 128 == 0 or th == H), (H, th)
        grid = (M_pad // tm, H // th)
        in_specs = [
            pl.BlockSpec((tm, C), lambda i, j: (i, 0)),   # x: token tile
            pl.BlockSpec((C, th), lambda i, j: (0, j)),   # W1^T: hidden slab
            pl.BlockSpec((th, C), lambda i, j: (j, 0)),   # W2^T: hidden slab
        ]
        out_specs = pl.BlockSpec((tm, C), lambda i, j: (i, 0))
        scratch_shapes = [pltpu.VMEM((tm, C), jnp.float32)]   # f32 accumulator
        dim_sem = ("parallel", "arbitrary")
        kernel = functools.partial(_ffn_streamed_kernel, approx_gelu=approx_gelu)
        # Weights are re-streamed once per token tile in this form.
        bytes_accessed = itemsize * (2 * M_pad * C + (M_pad // tm) * 2 * C * H)

    cost = pl.CostEstimate(
        flops=4 * M_pad * C * H,          # two matmuls
        transcendentals=M_pad * H,        # erf / tanh
        bytes_accessed=bytes_accessed,
    )

    out2d = pl.pallas_call(
        kernel,
        out_shape=jax.ShapeDtypeStruct((M_pad, C), x.dtype),
        grid_spec=pltpu.PrefetchScalarGridSpec(
            num_scalar_prefetch=0,
            grid=grid,
            in_specs=in_specs,
            out_specs=out_specs,
            scratch_shapes=scratch_shapes,
        ),
        compiler_params=pltpu.CompilerParams(
            dimension_semantics=dim_sem,
            # Above the 32 MiB scoped default, below v7x's 64 MiB physical.
            vmem_limit_bytes=48 * 1024 * 1024,
        ),
        cost_estimate=cost,
    )(x2d, w1_t, w2_t)

    return out2d[:M].reshape(B, T, C)


def _reference(x, w1_t, w2_t):
    h = jnp.dot(x, w1_t)
    h = 0.5 * h * (1.0 + jax.lax.erf(h / jnp.sqrt(2.0)))
    return jnp.dot(h, w2_t)


def _torch_linear_weight_t(key, c_in, c_out):
    """nn.Linear(c_in, c_out, bias=False) weight (out,in), returned transposed."""
    bound = 1.0 / (c_in ** 0.5)
    w = jax.random.uniform(key, (c_out, c_in), jnp.float32, -bound, bound)
    return w.T


if __name__ == "__main__":
    key = jax.random.PRNGKey(0)
    k_x, k_w1, k_w2, k_x2, k_w3, k_w4 = jax.random.split(key, 6)

    # --- Test 1: toy GPT width, f32, resident-weight path (auto) -------------
    B, T = 2, 8
    x = jax.random.normal(k_x, (B, T, N_EMBD), dtype=jnp.float32)
    w1_t = _torch_linear_weight_t(k_w1, N_EMBD, HIDDEN)    # (C, 4C)
    w2_t = _torch_linear_weight_t(k_w2, HIDDEN, N_EMBD)    # (4C, C)
    ref = _reference(x, w1_t, w2_t)

    out = gpt_feed_forward(x, w1_t, w2_t)
    jax.block_until_ready(out)
    assert out.shape == (B, T, N_EMBD)
    assert jnp.allclose(out, ref, atol=1e-4, rtol=1e-4), "f32 resident mismatch"

    # --- Test 2: bf16 storage path (operands hit the MXU in bf16) ------------
    out_bf16 = gpt_feed_forward(x.astype(jnp.bfloat16),
                                w1_t.astype(jnp.bfloat16),
                                w2_t.astype(jnp.bfloat16))
    jax.block_until_ready(out_bf16)
    assert jnp.allclose(out_bf16.astype(jnp.float32), ref,
                        atol=5e-2, rtol=5e-2), "bf16 resident mismatch"

    # --- Test 3: tanh-approx GELU (EUP path) runs and stays close ------------
    out_approx = gpt_feed_forward(x, w1_t, w2_t, approx_gelu=True)
    jax.block_until_ready(out_approx)
    assert jnp.allclose(out_approx, ref, atol=2e-2, rtol=2e-2), "approx mismatch"

    # --- Test 4: streamed (hidden-tiled) fallback + ragged token count -------
    C2, H2 = 128, 512
    B2, T2 = 2, 9                        # M = 18: not tile-aligned -> pad path
    x2 = jax.random.normal(k_x2, (B2, T2, C2), dtype=jnp.float32)
    w3_t = _torch_linear_weight_t(k_w3, C2, H2)
    w4_t = _torch_linear_weight_t(k_w4, H2, C2)
    out2 = gpt_feed_forward(x2, w3_t, w4_t, resident=False, th=128)
    jax.block_until_ready(out2)
    ref2 = _reference(x2, w3_t, w4_t)
    assert out2.shape == (B2, T2, C2)
    assert jnp.allclose(out2, ref2, atol=2e-3, rtol=2e-3), "streamed mismatch"

    print("KERNEL_OK")
</pallas_src>

<mosaic_0001>
module attributes {stable_mosaic.version = 11 : i64} {
  func.func @_ffn_resident_kernel(%arg0: i32, %arg1: memref<8x32xf32, #tpu.memory_space<vmem>>, %arg2: memref<32x128xf32, #tpu.memory_space<vmem>>, %arg3: memref<128x32xf32, #tpu.memory_space<vmem>>, %arg4: memref<8x32xf32, #tpu.memory_space<vmem>>) attributes {dimension_semantics = [#tpu.dimension_semantics<parallel>], iteration_bounds = array<i64: 2>, scalar_prefetch = 0 : i64, scratch_operands = 0 : i64, tpu.core_type = #tpu.core_type<tc>, window_params = [{transform_indices = @transform_0, window_bounds = array<i64: 8, 32>}, {pipeline_mode = #tpu.pipeline_mode<synchronous>, transform_indices = @transform_1, window_bounds = array<i64: 32, 128>}, {pipeline_mode = #tpu.pipeline_mode<synchronous>, transform_indices = @transform_2, window_bounds = array<i64: 128, 32>}, {transform_indices = @transform_3, window_bounds = array<i64: 8, 32>}]} {
    %c0 = arith.constant 0 : index
    %c0_0 = arith.constant 0 : index
    %0 = vector.load %arg1[%c0, %c0_0] : memref<8x32xf32, #tpu.memory_space<vmem>>, vector<8x32xf32>
    %c0_1 = arith.constant 0 : index
    %c0_2 = arith.constant 0 : index
    %1 = vector.load %arg2[%c0_1, %c0_2] : memref<32x128xf32, #tpu.memory_space<vmem>>, vector<32x128xf32>
    %cst = arith.constant dense<0.000000e+00> : vector<8x128xf32>
    %2 = tpu.matmul %0, %1, %cst {dimension_numbers = #tpu.dot_dimension_numbers<[1], [0], [0], [1], [0, 0, 1, 1], [], []>} : vector<8x32xf32>, vector<32x128xf32>, vector<8x128xf32> -> vector<8x128xf32>
    %cst_3 = arith.constant 0.707106769 : f32
    %3 = vector.broadcast %cst_3 : f32 to vector<8x128xf32>
    %4 = arith.mulf %2, %3 : vector<8x128xf32>
    %5 = math.erf %4 : vector<8x128xf32>
    %cst_4 = arith.constant 5.000000e-01 : f32
    %6 = vector.broadcast %cst_4 : f32 to vector<8x128xf32>
    %7 = arith.mulf %6, %2 : vector<8x128xf32>
    %cst_5 = arith.constant 1.000000e+00 : f32
    %8 = vector.broadcast %cst_5 : f32 to vector<8x128xf32>
    %9 = arith.addf %8, %5 : vector<8x128xf32>
    %10 = arith.mulf %7, %9 : vector<8x128xf32>
    %c0_6 = arith.constant 0 : index
    %c0_7 = arith.constant 0 : index
    %11 = vector.load %arg3[%c0_6, %c0_7] : memref<128x32xf32, #tpu.memory_space<vmem>>, vector<128x32xf32>
    %cst_8 = arith.constant dense<0.000000e+00> : vector<8x32xf32>
    %12 = tpu.matmul %10, %11, %cst_8 {dimension_numbers = #tpu.dot_dimension_numbers<[1], [0], [0], [1], [0, 0, 1, 1], [], []>} : vector<8x128xf32>, vector<128x32xf32>, vector<8x32xf32> -> vector<8x32xf32>
    %c0_9 = arith.constant 0 : index
    %c0_10 = arith.constant 0 : index
    %13 = vector.load %arg4[%c0_9, %c0_10] : memref<8x32xf32, #tpu.memory_space<vmem>>, vector<8x32xf32>
    tpu.vector_store %arg4[%c0_9, %c0_10], %12 {strides = array<i32>} : memref<8x32xf32, #tpu.memory_space<vmem>>, vector<8x32xf32>,
    return
  }
  func.func @transform_0(%arg0: i32) -> (i32, i32) {
    %c0_i32 = arith.constant 0 : i32
    %c0_i32_0 = arith.constant 0 : i32
    return %arg0, %c0_i32 : i32, i32
  }
  func.func @transform_1(%arg0: i32) -> (i32, i32) {
    %c0_i32 = arith.constant 0 : i32
    %c0_i32_0 = arith.constant 0 : i32
    %c0_i32_1 = arith.constant 0 : i32
    return %c0_i32, %c0_i32_0 : i32, i32
  }
  func.func @transform_2(%arg0: i32) -> (i32, i32) {
    %c0_i32 = arith.constant 0 : i32
    %c0_i32_0 = arith.constant 0 : i32
    %c0_i32_1 = arith.constant 0 : i32
    return %c0_i32, %c0_i32_0 : i32, i32
  }
  func.func @transform_3(%arg0: i32) -> (i32, i32) {
    %c0_i32 = arith.constant 0 : i32
    %c0_i32_0 = arith.constant 0 : i32
    return %arg0, %c0_i32 : i32, i32
  }
}

</mosaic_0001>

<bundles_post_ra>
// kernel: gpt_feed_forward.1
= control target key start
LH: loop header
LB: loop body
LE: loop exit
PB: predicated region body
PF: predicated region fallthrough
CT: control target
= control target key end

     0   :  { %8 = vsyncpa [#allocation3], 0  ;;  %s635_s0 = inlined_call_operand.vmem [shape: f32[16,32], index: 0, kind: input, shape index: {}]   ;;  %s636_s1 = inlined_call_operand.vmem [shape: f32[32,128], index: 1, kind: input, shape index: {}]   ;;  %s637_s2 = inlined_call_operand.vmem [shape: f32[128,32], index: 2, kind: input, shape index: {}]   ;;  %s638_s3 = inlined_call_operand.hbm [shape: f32[16,32], index: 3, kind: output, shape index: {}]  }
   0x1   :  { %10 = vsyncpa [#allocation3 + $0x1], 0  ;;  %s488_s12 = smov 0   ;;  %s490_s13 = smov 0  }
   0x2   :  { %s492_s14 = smov 0   ;;  %s494_s15 = smov 0  }
   0x3 LB: > { %s509_s16 = sadd.s32 4294967295, %s466_s15   ;;  %s351_s17 = sadd.s32 4294967294, %s466_s15   ;;  %s466_s15 = sphi %s494_s15, %s644_s15   ;;  %s462_s14 = sphi %s492_s14, %s643_s14   ;;  %s458_s13 = sphi %s490_s13, %s642_s13   ;;  %s454_s12 = sphi %s488_s12, %s641_s12  }
   0x4   : > { %s513_s18 = sadd.s32 1, %s466_s15   ;;  %s91_s19 = sadd.s32 1, %s462_s14 }
   0x5   : > { %s88_s20 = ssub.s32 %s466_s15, %s513_s18  ;;  %p101_p0 = scmp.ne.s32.totalorder %s462_s14, %s458_s13 }
   0x6   : > { %p89_p1 = scmp.eq.s32.totalorder %s88_s20, 0  ;;  %p102_p2 = scmp.eq.s32.totalorder %s509_s16, 1 }
   0x7   : > { %p107_p3 = scmp.ne.s32.totalorder %s458_s13, %s454_s12  ;;  %p108_p4 = scmp.eq.s32.totalorder %s351_s17, 1 }
   0x8   : > { %s524_s21 = scalar_select %p89_p1, %s462_s14, %s91_s19  }
   0x9   : > { %p526_p5 = por %p102_p2, %p101_p0  ;;  %p530_p6 = por %p108_p4, %p107_p3 }
   0xa   : > { %p354_p7 = scmp.ge.s32.totalorder %s466_s15, 1  ;;  %p139_p8 = scmp.lt.s32.totalorder %s466_s15, 3 }
   0xc   : > { %p140_p9 = pnand %p354_p7, %p139_p8 }
   0xd   : > { %p162_p10 = scmp.lt.s32.totalorder (!%p140_p9), %s509_s16, 1  ;;  %s360_s8 = sshll.u32 (!%p140_p9), %s509_s16, 3 }
   0xe   : > { %143 = sbr.rel (%p140_p9) target bundleno = 333 (0x14d), region = 32  ;;  %s287_s11 = scalar_lea.hbm (!%p140_p9), %s638_s3, %s360_s8 }
   0xf   : > { %s291_s20 = sshll.u32 (!%p140_p9), %s287_s11, 4  ;;  %s424_s28 = scalar_lea.hbm (!%p140_p9), %s638_s3, 16  ;;  %s292_s20 = int_to_ptr.hbm [resolvable:$true] %s291_s20 }
  0x10   : > { %s418_s25 = sshra.s32 (!%p140_p9), %s292_s20, 4  ;;  %s419_s25 = int_to_ptr.hbm [resolvable:$true] %s418_s25 }
  0x11   : > { %s420_s26 = scalar_lea.hbm (!%p140_p9), %s419_s25, 8  ;;  %p425_p0 = scmp.lt.s32.totalorder (!%p140_p9), %s419_s25, %s638_s3 }
  0x12   : > { %p421_p11 = scmp.ne.s32.totalorder (!%p140_p9), %s419_s25, %s420_s26  ;;  %p426_p1 = scmp.lt.s32.totalorder (!%p140_p9), %s424_s28, %s420_s26 }
  0x13   : > { %v170_v0 = vld [vmem:[%s636_s1 + $0x18] sm:$0xff]  ;;  %v169_v1 = vld [vmem:[%s636_s1 + $0x10] sm:$0xff]  ;;  %v168_v2 = vld [vmem:[%s636_s1 + $0x8] sm:$0xff]  ;;  %s163_s30 = scalar_select %p162_p10, %s509_s16, 1  ;;  %vm171_vm0 = vcmask 261120  }
  0x14   : > { %187 = vmatpush.msra.mxu0 %v170_v0  ;;  %v167_v3 = vld [vmem:[%s636_s1] sm:$0xff]  ;;  %v254_v5 = vld [vmem:[%s637_s2 + $0x78] sm:$0xff]  ;;  %v253_v6 = vld [vmem:[%s637_s2 + $0x70] sm:$0xff]  ;;  %p422_p12 = pnand %p421_p11, %p526_p5  ;;  %p427_p2 = por %p426_p1, %p425_p0 }
  0x15   : > { %s356_s6 = sshll.u32 %s163_s30, 3  ;;  %255 = vmatpush.msra.mxu1 %v254_v5  ;;  %v252_v7 = vld [vmem:[%s637_s2 + $0x68] sm:$0xff]  ;;  %v251_v8 = vld [vmem:[%s637_s2 + $0x60] sm:$0xff]  ;;  %v250_v9 = vld [vmem:[%s637_s2 + $0x58] sm:$0xff] }
  0x16   : > { %188 = vmatpush.msra.mxu0 %v169_v1  ;;  %s165_s9 = scalar_lea.vmem %s635_s0, %s356_s6  ;;  %v249_v10 = vld [vmem:[%s637_s2 + $0x50] sm:$0xff]  ;;  %v248_v11 = vld [vmem:[%s637_s2 + $0x48] sm:$0xff]  ;;  %v247_v13 = vld [vmem:[%s637_s2 + $0x40] sm:$0xff]  ;;  %s159_s6 = sand.u32 1, %s458_s13  }
  0x17   : > { %v166_v4 = vld [vmem:[%s165_s9] sm:$0xff]  ;;  %256 = vmatpush.msra.mxu1 %v253_v6  ;;  %v246_v15 = vld [vmem:[%s637_s2 + $0x38] sm:$0xff]  ;;  %v245_v17 = vld [vmem:[%s637_s2 + $0x30] sm:$0xff]  ;;  %s355_s7 = sshll.u32 %s159_s6, 3  ;;  %s277_s24 = scalar_lea.sflag [#allocation3], %s159_s6 }
  0x18   : > { %189 = vmatpush.msra.mxu0 %v168_v2  ;;  %v244_v19 = vld [vmem:[%s637_s2 + $0x28] sm:$0xff]  ;;  %v243_v22 = vld [vmem:[%s637_s2 + $0x20] sm:$0xff]  ;;  %v242_v25 = vld [vmem:[%s637_s2 + $0x18] sm:$0xff]  ;;  %s161_s17 = scalar_lea.vmem [#allocation2], %s355_s7  ;;  %p423_p13 = pneg %p422_p12 }
  0x19   : > { %257 = vmatpush.msra.mxu1 %v252_v7  ;;  %v241_v28 = vld [vmem:[%s637_s2 + $0x10] sm:$0xff]  ;;  %v240_v31 = vld [vmem:[%s637_s2 + $0x8] sm:$0xff]  ;;  %v239_v33 = vld [vmem:[%s637_s2] sm:$0xff]  ;;  %s289_s19 = sshll.u32 %s161_s17, 4  ;;  %s290_s19 = int_to_ptr.vmem [resolvable:$true] %s289_s19 }
  0x1a   : > { %190 = vmatpush.msra.mxu0 %v167_v3  ;;  %p428_p3 = pnand %p427_p2, %p423_p13 }
  0x1b   : > { %357 = vmatmul.msk.f32.vlgmr.msra.gmra.mxu0 %vm171_vm0, %v166_v4  ;;  %258 = vmatpush.msra.mxu1 %v251_v8 }
  0x1d   : > { %259 = vmatpush.msra.mxu1 %v250_v9 }
  0x1f   : > { %260 = vmatpush.msra.mxu1 %v249_v10 }
  0x21   : > { %261 = vmatpush.msra.mxu1 %v248_v11 }
  0x23   : > { %262 = vmatpush.msra.mxu1 %v247_v13 }
  0x25   : > { %263 = vmatpush.msra.mxu1 %v246_v15 }
  0x27   : > { %264 = vmatpush.msra.mxu1 %v245_v17 }
  0x29   : > { %265 = vmatpush.msra.mxu1 %v244_v19 }
  0x2b   : > { %266 = vmatpush.msra.mxu1 %v243_v22 }
  0x2d   : > { %267 = vmatpush.msra.mxu1 %v242_v25 }
  0x2f   : > { %268 = vmatpush.msra.mxu1 %v241_v28 }
  0x31   : > { %269 = vmatpush.msra.mxu1 %v240_v31 }
  0x33   : > { %270 = vmatpush.msra.mxu1 %v239_v33 }
  0x98   : > { %v192_v12 = vpop.f32.mrf.mxu0 }
  0x99   : > { %v195_v14 = vmul.f32 0.70710677, %v192_v12  ;;  %v236_v58 = vmul.f32 0.5, %v192_v12 }
  0x9b   : > { %v196_v16 = vmul.f32 %v195_v14, %v195_v14 }
  0x9d   : > { %v197_v18 = vmin.f32 %v196_v16, 16.0 }
  0x9f   : > { %v198_v20 = vmul.f32 2.1237322e-06, %v197_v18  ;;  %v209_v21 = vmul.f32 3.8918573e-05, %v197_v18 }
  0xa1   : > { %v199_v23 = vadd.f32 0.00028619796, %v198_v20  ;;  %v210_v24 = vadd.f32 0.001143296, %v209_v21 }
  0xa3   : > { %v200_v26 = vmul.f32 %v199_v23, %v197_v18  ;;  %v211_v27 = vmul.f32 %v210_v24, %v197_v18 }
  0xa5   : > { %v212_v29 = vadd.f32 0.014752088, %v211_v27  ;;  %v201_v30 = vadd.f32 0.0036580483, %v200_v26 }
  0xa7   : > { %v213_v32 = vmul.f32 %v212_v29, %v197_v18  ;;  %v202_v35 = vmul.f32 %v201_v30, %v197_v18 }
  0xa9   : > { %v214_v34 = vadd.f32 0.112945676, %v213_v32  ;;  %v203_v38 = vadd.f32 0.05243302, %v202_v35 }
  0xab   : > { %v215_v36 = vmul.f32 %v214_v34, %v197_v18  ;;  %v204_v41 = vmul.f32 %v203_v38, %v197_v18 }
  0xad   : > { %v216_v37 = vadd.f32 0.4994258, %v215_v36  ;;  %v205_v42 = vadd.f32 0.18741608, %v204_v41 }
  0xaf   : > { %v217_v39 = vmul.f32 %v216_v37, %v197_v18  ;;  %v206_v44 = vmul.f32 %v205_v42, %v197_v18 }
  0xb1   : > { %v218_v40 = vadd.f32 1.0, %v217_v39  ;;  %v207_v48 = vadd.f32 1.1283791, %v206_v44 }
  0xb3   : > { %402 = vrcp.f32 %v218_v40  ;;  %v230_v47 = vand.u32 2147483648, %v218_v40  ;;  %v228_v50 = vand.u32 2147483647, %v218_v40  ;;  %vm224_vm2 = vweird.f32 %v218_v40 }
  0xb4   : > { %v208_v53 = vmul.f32 %v207_v48, %v195_v14 }
  0xb5   : > { %v231_v52 = vor.u32 1.1754944e-38, %v230_v47  ;;  %vm229_vm4 = vcmp.eq.f32.partialorder %v228_v50, 8.507059e+37 }
  0xb9   : > { %v403_v43 = vpop.eup %402 }
  0xba   : > { %v220_v45 = vmul.f32 %v403_v43, %v218_v40  ;;  %vm225_vm1 = vweird.f32 %v403_v43 }
  0xbb   : > { %vm226_vm3 = vmor %vm224_vm2, %vm225_vm1 }
  0xbc   : > { %v221_v46 = vsub.f32 1.0, %v220_v45 }
  0xbe   : > { %v222_v49 = vmul.f32 %v403_v43, %v221_v46 }
  0xc0   : > { %v223_v51 = vadd.f32 %v403_v43, %v222_v49 }
  0xc2   : > { %v227_v54 = vsel %vm226_vm3, %v403_v43, %v223_v51 }
  0xc3   : > { %v232_v55 = vsel %vm229_vm4, %v231_v52, %v227_v54 }
  0xc4   : > { %v233_v56 = vmul.f32 %v232_v55, %v208_v53 }
  0xc6   : > { %v358_v57 = vclamps-f32 %v233_v56, 1.0 }
  0xc8   : > { %v237_v59 = vadd.f32 1.0, %v358_v57 }
  0xca   : > { %v238_v60 = vmul.f32 %v237_v59, %v236_v58 }
  0xcc   : > { %271 = vmatmul.f32.vlgmr.msra.gmra.mxu1 %v238_v60 }
 0x149   : > { %v272_v61 = vpop.f32.mrf.mxu1 }
 0x14a   : > { %275 = vst.msk [vmem:[%s161_s17] sm:$0xff] %vm171_vm0, %v272_v61 }
 0x14b   : > { %431 = shalt.err (!%p428_p3)
}
 0x14c   : > { %363 = dma.vmem_to_hbm [thread:$0]  (%p526_p5), %s290_s19, 128, %s292_s20, %s277_s24  }
 0x14d PF: > { %p369_p4 = scmp.ge.s32.totalorder %s466_s15, 2  ;;  %s303_s4 = sand.u32 1, %s454_s12  }
 0x14e   : > { %s304_s5 = scalar_lea.sflag [#allocation3], %s303_s4 }
 0x14f   : > { %p366_p7 = pnand %p369_p4, %p530_p6 }
 0x151   : > { %p367_p8 = pneg %p366_p7 }
 0x153   : > { %449 = dma.done.wait (%p367_p8), %s304_s5, 128  }
 0x154   : > { %451 = vsyncadd (%p367_p8), %s304_s5, 4294967168  ;;  %p13_p9 = scmp.ge.s32.totalorder %s513_s18, 4   ;;  %s641_s12 = smov %s458_s13 }
 0x155   : > { %s642_s13 = smov %s462_s14  ;;  %s643_s14 = smov %s524_s21 }
 0x156   : > { %s644_s15 = smov %s513_s18  ;;  %15 = sbr.rel (!%p13_p9) target bundleno = 3 (0x3), region = 67 }
 0x15b   :  { %310 = vsyncpa [#allocation3], 1 }
 0x15c   :  { %312 = vsyncpa [#allocation3 + $0x1], 1 }

</bundles_post_ra>
